<compile_context>
chip_gen: v6e
topology: v6e:2x2x1
jax: 0.10.0
libtpu: 0.0.40
codegen_flags: <defaults>
</compile_context>

<pallas_src>
import jax
import jax.numpy as jnp
from jax.experimental import pallas as pl
from jax.experimental.pallas import tpu as pltpu


def _mlp_kernel(state_ref, belief_ref, w1s_ref, w1b_ref, b1_ref,
                w2_ref, b2_ref, o_ref):
    # fc1 on the (virtually) concatenated input, expressed as two partial
    # matmuls so the concat never materializes. Two MXU matmuls + bias/ReLU on
    # the VPU, all within one VMEM tile. f32 accumulation throughout.
    # TODO(synk): for large batched use on v6e/v7x, cast activations/weights to
    # bf16 (keep preferred_element_type=f32) to reach MXU peak and halve bytes.
    h = (
        jnp.dot(state_ref[...], w1s_ref[...], preferred_element_type=jnp.float32)
        + jnp.dot(belief_ref[...], w1b_ref[...], preferred_element_type=jnp.float32)
        + b1_ref[...]
    )
    h = jnp.maximum(h, 0.0)
    o = jnp.dot(h, w2_ref[...], preferred_element_type=jnp.float32) + b2_ref[...]
    o_ref[...] = jnp.maximum(o, 0.0).astype(o_ref.dtype)


def _forward_single_tile(state, belief, w1s, w1b, b1, w2, b2):
    """Grid-less path: whole problem fits in one VMEM tile (small B)."""
    B = state.shape[0]
    O = w2.shape[1]
    vmem = pl.BlockSpec(memory_space=pltpu.MemorySpace.VMEM)
    return pl.pallas_call(
        _mlp_kernel,
        out_shape=jax.ShapeDtypeStruct((B, O), jnp.float32),
        in_specs=[vmem] * 7,
        out_specs=vmem,
    )(state, belief, w1s, w1b, b1, w2, b2)


def _forward_batched(state, belief, w1s, w1b, b1, w2, b2, *, tm=128):
    """Tiled path for large B: grid over batch rows, weights resident."""
    B, ds = state.shape
    db = belief.shape[1]
    H = w1s.shape[1]
    O = w2.shape[1]

    b_pad = pl.cdiv(B, tm) * tm
    if b_pad != B:
        pad = b_pad - B
        state = jnp.pad(state, ((0, pad), (0, 0)))
        belief = jnp.pad(belief, ((0, pad), (0, 0)))

    out = pl.pallas_call(
        _mlp_kernel,
        out_shape=jax.ShapeDtypeStruct((b_pad, O), jnp.float32),
        grid=(b_pad // tm,),
        in_specs=[
            pl.BlockSpec((tm, ds), lambda i: (i, 0)),   # state rows
            pl.BlockSpec((tm, db), lambda i: (i, 0)),   # belief rows
            pl.BlockSpec((ds, H), lambda i: (0, 0)),    # w1_state (resident)
            pl.BlockSpec((db, H), lambda i: (0, 0)),    # w1_belief (resident)
            pl.BlockSpec((1, H), lambda i: (0, 0)),     # b1 (resident)
            pl.BlockSpec((H, O), lambda i: (0, 0)),     # w2 (resident)
            pl.BlockSpec((1, O), lambda i: (0, 0)),     # b2 (resident)
        ],
        out_specs=pl.BlockSpec((tm, O), lambda i: (i, 0)),
        compiler_params=pltpu.CompilerParams(
            # "parallel" lets v7x shard the batch axis across its 2 TCs;
            # neutral on v5e/v6e.
            dimension_semantics=("parallel",)
        ),
    )(state, belief, w1s, w1b, b1, w2, b2)
    return out[:B]


def stochastic_net_bernoulli_forward(state, belief, w1_state, w1_belief, b1,
                                     w2, b2, *, batch_tile=128):
    """Forward pass of StochasticNet_Bernoulli.

    state:     (B, ds) f32
    belief:    (B, db) f32
    w1_state:  (ds, H) f32   (= fc1.weight.T[:ds]   — split once at param prep)
    w1_belief: (db, H) f32   (= fc1.weight.T[ds:])
    b1:        (1, H) f32
    w2:        (H, O) f32    (= fc3.weight.T)
    b2:        (1, O) f32
    returns logits: (B, O) f32
    """
    if state.shape[0] >= batch_tile:
        return _forward_batched(state, belief, w1_state, w1_belief, b1, w2, b2,
                                tm=batch_tile)
    return _forward_single_tile(state, belief, w1_state, w1_belief, b1, w2, b2)


def _init_linear(key, fan_in, fan_out):
    # Deterministic init mimicking nn.Linear's U(-1/sqrt(fan_in), 1/sqrt(fan_in)).
    kw, kb = jax.random.split(key)
    bound = 1.0 / jnp.sqrt(fan_in)
    w = jax.random.uniform(kw, (fan_in, fan_out), jnp.float32, -bound, bound)
    b = jax.random.uniform(kb, (1, fan_out), jnp.float32, -bound, bound)
    return w, b


if __name__ == "__main__":
    # Small shapes consistent with the module: state/belief features concat to in_dim.
    B = 2
    state_dim = 16
    belief_dim = 16
    in_dim = state_dim + belief_dim  # 32
    h_dim = 32
    out_dim = 16

    key = jax.random.PRNGKey(0)
    k_state, k_belief, k_fc1, k_fc3 = jax.random.split(key, 4)

    state = jax.random.normal(k_state, (B, state_dim), jnp.float32)
    belief = jax.random.normal(k_belief, (B, belief_dim), jnp.float32)

    w1, b1 = _init_linear(k_fc1, in_dim, h_dim)
    w2, b2 = _init_linear(k_fc3, h_dim, out_dim)

    # One-time parameter prep: split fc1's weight along the concat axis so the
    # kernel never needs the concatenated x.
    w1_state, w1_belief = w1[:state_dim], w1[state_dim:]

    # --- small-batch (grid-less) path -------------------------------------
    logits = stochastic_net_bernoulli_forward(
        state, belief, w1_state, w1_belief, b1, w2, b2)
    logits = jax.block_until_ready(logits)

    x = jnp.concatenate([state, belief], axis=1)
    ref = jnp.maximum(jnp.maximum(x @ w1 + b1, 0.0) @ w2 + b2, 0.0)
    assert logits.shape == (B, out_dim)
    assert jnp.allclose(logits, ref, atol=1e-5, rtol=1e-5)

    # --- batched (tiled-over-B, "parallel") path ---------------------------
    Bb = 256
    kb_s, kb_b = jax.random.split(jax.random.PRNGKey(1))
    state_b = jax.random.normal(kb_s, (Bb, state_dim), jnp.float32)
    belief_b = jax.random.normal(kb_b, (Bb, belief_dim), jnp.float32)
    logits_b = stochastic_net_bernoulli_forward(
        state_b, belief_b, w1_state, w1_belief, b1, w2, b2)
    logits_b = jax.block_until_ready(logits_b)

    xb = jnp.concatenate([state_b, belief_b], axis=1)
    ref_b = jnp.maximum(jnp.maximum(xb @ w1 + b1, 0.0) @ w2 + b2, 0.0)
    assert logits_b.shape == (Bb, out_dim)
    assert jnp.allclose(logits_b, ref_b, atol=1e-5, rtol=1e-5)

    # TODO(synk): Bernoulli sampling / log_prob (get_dist, sample, log_prob) are
    # distribution utilities outside the forward hot path and are not kernelized.
    print("KERNEL_OK")
</pallas_src>

<mosaic_0001>
module attributes {stable_mosaic.version = 11 : i64} {
  func.func @_mlp_kernel(%arg0: memref<2x16xf32, #tpu.memory_space<vmem>>, %arg1: memref<2x16xf32, #tpu.memory_space<vmem>>, %arg2: memref<16x32xf32, #tpu.memory_space<vmem>>, %arg3: memref<16x32xf32, #tpu.memory_space<vmem>>, %arg4: memref<1x32xf32, #tpu.memory_space<vmem>>, %arg5: memref<32x16xf32, #tpu.memory_space<vmem>>, %arg6: memref<1x16xf32, #tpu.memory_space<vmem>>, %arg7: memref<2x16xf32, #tpu.memory_space<vmem>>) attributes {dimension_semantics = [], scalar_prefetch = 0 : i64, scratch_operands = 0 : i64, tpu.core_type = #tpu.core_type<tc>} {
    %c0 = arith.constant 0 : index
    %c0_0 = arith.constant 0 : index
    %0 = vector.load %arg0[%c0, %c0_0] : memref<2x16xf32, #tpu.memory_space<vmem>>, vector<2x16xf32>
    %c0_1 = arith.constant 0 : index
    %c0_2 = arith.constant 0 : index
    %1 = vector.load %arg2[%c0_1, %c0_2] : memref<16x32xf32, #tpu.memory_space<vmem>>, vector<16x32xf32>
    %cst = arith.constant dense<0.000000e+00> : vector<2x32xf32>
    %2 = tpu.matmul %0, %1, %cst {dimension_numbers = #tpu.dot_dimension_numbers<[1], [0], [0], [1], [0, 0, 1, 1], [], []>} : vector<2x16xf32>, vector<16x32xf32>, vector<2x32xf32> -> vector<2x32xf32>
    %c0_3 = arith.constant 0 : index
    %c0_4 = arith.constant 0 : index
    %3 = vector.load %arg1[%c0_3, %c0_4] : memref<2x16xf32, #tpu.memory_space<vmem>>, vector<2x16xf32>
    %c0_5 = arith.constant 0 : index
    %c0_6 = arith.constant 0 : index
    %4 = vector.load %arg3[%c0_5, %c0_6] : memref<16x32xf32, #tpu.memory_space<vmem>>, vector<16x32xf32>
    %cst_7 = arith.constant dense<0.000000e+00> : vector<2x32xf32>
    %5 = tpu.matmul %3, %4, %cst_7 {dimension_numbers = #tpu.dot_dimension_numbers<[1], [0], [0], [1], [0, 0, 1, 1], [], []>} : vector<2x16xf32>, vector<16x32xf32>, vector<2x32xf32> -> vector<2x32xf32>
    %6 = arith.addf %2, %5 : vector<2x32xf32>
    %c0_8 = arith.constant 0 : index
    %c0_9 = arith.constant 0 : index
    %7 = vector.load %arg4[%c0_8, %c0_9] : memref<1x32xf32, #tpu.memory_space<vmem>>, vector<1x32xf32>
    %8 = vector.broadcast %7 : vector<1x32xf32> to vector<2x32xf32>
    %9 = arith.addf %6, %8 : vector<2x32xf32>
    %cst_10 = arith.constant 0.000000e+00 : f32
    %10 = vector.broadcast %cst_10 : f32 to vector<2x32xf32>
    %11 = arith.maximumf %9, %10 : vector<2x32xf32>
    %c0_11 = arith.constant 0 : index
    %c0_12 = arith.constant 0 : index
    %12 = vector.load %arg5[%c0_11, %c0_12] : memref<32x16xf32, #tpu.memory_space<vmem>>, vector<32x16xf32>
    %cst_13 = arith.constant dense<0.000000e+00> : vector<2x16xf32>
    %13 = tpu.matmul %11, %12, %cst_13 {dimension_numbers = #tpu.dot_dimension_numbers<[1], [0], [0], [1], [0, 0, 1, 1], [], []>} : vector<2x32xf32>, vector<32x16xf32>, vector<2x16xf32> -> vector<2x16xf32>
    %c0_14 = arith.constant 0 : index
    %c0_15 = arith.constant 0 : index
    %14 = vector.load %arg6[%c0_14, %c0_15] : memref<1x16xf32, #tpu.memory_space<vmem>>, vector<1x16xf32>
    %15 = vector.broadcast %14 : vector<1x16xf32> to vector<2x16xf32>
    %16 = arith.addf %13, %15 : vector<2x16xf32>
    %cst_16 = arith.constant 0.000000e+00 : f32
    %17 = vector.broadcast %cst_16 : f32 to vector<2x16xf32>
    %18 = arith.maximumf %16, %17 : vector<2x16xf32>
    %c0_17 = arith.constant 0 : index
    %c0_18 = arith.constant 0 : index
    %19 = vector.load %arg7[%c0_17, %c0_18] : memref<2x16xf32, #tpu.memory_space<vmem>>, vector<2x16xf32>
    tpu.vector_store %arg7[%c0_17, %c0_18], %18 {strides = array<i32>} : memref<2x16xf32, #tpu.memory_space<vmem>>, vector<2x16xf32>,
    return
  }
}

</mosaic_0001>

<bundles_post_ra>
// kernel: tpu_custom_call.1
= control target key start
LH: loop header
LB: loop body
LE: loop exit
PB: predicated region body
PF: predicated region fallthrough
CT: control target
= control target key end

     0   :  { %v357_v1 = vmov 0.0   ;;  %vm358_vm0 = vmmov 0   ;;  %vm33_vm1 = vcmask 130048   ;;  %s439_s0 = inlined_call_operand.vmem [shape: f32[2,16], index: 0, kind: input, shape index: {}]   ;;  %s440_s1 = inlined_call_operand.vmem [shape: f32[2,16], index: 1, kind: input, shape index: {}]   ;;  %s441_s2 = inlined_call_operand.vmem [shape: f32[16,32], index: 2, kind: input, shape index: {}]   ;;  %s442_s3 = inlined_call_operand.vmem [shape: f32[16,32], index: 3, kind: input, shape index: {}]   ;;  %s443_s4 = inlined_call_operand.vmem [shape: f32[1,32], index: 4, kind: input, shape index: {}]   ;;  %s444_s5 = inlined_call_operand.vmem [shape: f32[32,16], index: 5, kind: input, shape index: {}]   ;;  %s445_s6 = inlined_call_operand.vmem [shape: f32[1,16], index: 6, kind: input, shape index: {}]   ;;  %s446_s7 = inlined_call_operand.hbm [shape: f32[2,16], index: 7, kind: output, shape index: {}]  }
   0x1   :  { %v32_v0 = vld [vmem:[%s442_s3 + $0x8] sm:$0xff]  ;;  %307 = vmatprep.subr.mxu1 %v357_v1  ;;  %v31_v2 = vld [vmem:[%s442_s3] sm:$0xff]  ;;  %311 = vmatprep.mubr.msk.f32.mxu1 %vm358_vm0, %v357_v1 }
   0x2   :  { %308 = vmatpush3.msra.mxu1 %v32_v0  ;;  %v30_v3 = vld [vmem:[%s440_s1] sm:$0x3]  ;;  %321 = vmatprep.subr.mxu0 %v357_v1 }
   0x3   :  { %12 = vsyncpa [#allocation3], 0  ;;  %309 = vmatprep.subr.mxu1 %v357_v1  ;;  %v29_v4 = vld [vmem:[%s441_s2 + $0x8] sm:$0xff]  ;;  %329 = vmatprep.mubr.msk.f32.mxu0 %vm358_vm0, %v357_v1  ;;  %v28_v5 = vld [vmem:[%s441_s2] sm:$0xff]  ;;  %vm200_vm2 = vcmask 261120   ;;  %vm275_vm3 = vcmask 123904  }
   0x4   :  { %310 = vmatpush3.msra.mxu1 %v31_v2  ;;  %v27_v6 = vld [vmem:[%s439_s0] sm:$0x3]  ;;  %v192_v7 = vld [vmem:[%s444_s5 + $0x18] sm:$0xff]  ;;  %v191_v8 = vld [vmem:[%s444_s5 + $0x10] sm:$0xff] }
   0x5   :  { %312 = vmatmul.mubr.msk.f32.vlgmr.msra.gmra.mxu1 %vm33_vm1, %v30_v3  ;;  %314 = vmatprep.subr.mxu1 %v357_v1  ;;  %v190_v9 = vld [vmem:[%s444_s5 + $0x8] sm:$0xff]  ;;  %v189_v10 = vld [vmem:[%s444_s5] sm:$0xff]  ;;  %s359_s5 = smov [#allocation2]  }
   0x6   :  { %315 = vmatpush3.msra.mxu1 %v29_v4  ;;  %318 = vmatprep.mubr.msk.f32.mxu1 %vm358_vm0, %v357_v1  ;;  %v293_v14 = vld [vmem:[%s443_s4] ss:$0 sm:$0xff]  ;;  %s283_s21 = sshll.u32 %s359_s5, 4  ;;  %s284_s21 = int_to_ptr.vmem [resolvable:$true] %s283_s21 }
   0x7   :  { %316 = vmatprep.subr.mxu1 %v357_v1  ;;  %322 = vmatpush3.msra.mxu0 %v192_v7  ;;  %v294_v19 = vld [vmem:[%s445_s6] ss:$0 sm:$0xff]  ;;  %s335_s4 = scalar_lea.vmem %s284_s21, 32  ;;  %p340_p1 = scmp.lt.s32.totalorder %s284_s21, %s284_s21 }
   0x8   :  { %317 = vmatpush3.msra.mxu1 %v28_v5  ;;  %323 = vmatprep.subr.mxu0 %v357_v1  ;;  %p336_p0 = scmp.ne.s32.totalorder %s284_s21, %s335_s4  ;;  %p341_p2 = scmp.lt.s32.totalorder %s335_s4, %s335_s4 }
   0x9   :  { %319 = vmatmul.mubr.msk.f32.vlgmr.msra.gmra.mxu1 %vm33_vm1, %v27_v6  ;;  %324 = vmatpush3.msra.mxu0 %v191_v8 }
   0xa   :  { %325 = vmatprep.subr.mxu0 %v357_v1  ;;  %p342_p3 = por %p341_p2, %p340_p1 }
   0xb   :  { %326 = vmatpush3.msra.mxu0 %v190_v9 }
   0xc   :  { %327 = vmatprep.subr.mxu0 %v357_v1  ;;  %p343_p4 = pnand %p342_p3, %p336_p0 }
   0xd   :  { %328 = vmatpush3.msra.mxu0 %v189_v10 }
  0xc5   :  { %v103_v11 = vpop.f32.mrf.mxu1 }
  0xc7   :  { %v313_v12 = vpop.f32.mrf.mxu1 }
  0xc9   :  { %v176_v13 = vpop.f32.mrf.mxu1 }
  0xca   :  { %v177_v15 = vadd.f32 %v176_v13, %v103_v11 }
  0xcb   :  { %v320_v16 = vpop.f32.mrf.mxu1 }
  0xcc   :  { %v187_v17 = vadd.f32 %v293_v14, %v177_v15 }
  0xce   :  { %v188_v18 = vmax.f32 %v187_v17, 0.0 }
  0xd0   :  { %330 = vmatmul.mubr.msk.f32.vlgmr.msra.gmra.mxu0 %vm200_vm2, %v188_v18 }
 0x190   :  { %v270_v20 = vpop.f32.mrf.mxu0 }
 0x191   :  { %v271_v21 = vadd.f32 %v294_v19, %v270_v20 }
 0x192   :  { %v331_v22 = vpop.f32.mrf.mxu0 }
 0x193   :  { %v274_v23 = vmax.f32 %v271_v21, 0.0 }
 0x195   :  { %276 = vst.msk [vmem:[#allocation2] sm:$0x3] %vm275_vm3, %v274_v23 }
 0x196   :  { %346 = shalt.err (!%p343_p4)
}
 0x197   :  { %286 = dma.vmem_to_hbm [thread:$0]  %s284_s21, 32, %s446_s7, [#allocation3]  }
 0x198   :  { %355 = dma.done.wait [#allocation3], 32  }
 0x199   :  { %356 = vsyncadd [#allocation3], 4294967264 }
 0x19a   :  { %290 = vsyncpa [#allocation3], 1 }

</bundles_post_ra>
